<compile_context>
chip_gen: v7x
topology: tpu7x:2x2x1
jax: 0.10.0
libtpu: 0.0.40
codegen_flags: <defaults>
</compile_context>

<pallas_src>
import functools

import jax
import jax.numpy as jnp
import numpy as np
from jax.experimental import pallas as pl
from jax.experimental.pallas import tpu as pltpu


# --------------------------------------------------------------------------- #
# cached small constants
# --------------------------------------------------------------------------- #
@functools.lru_cache(maxsize=None)
def _pool_h_matrix(h_in, factor, dtype):
    """(h_in, h_in//factor) matrix with 1/factor**2 at [h, h//factor].

    Combined with a plain sum over `factor` sublane-strided row sets this gives
    the full factor x factor average pool.
    """
    h_out = h_in // factor
    m = np.zeros((h_in, h_out), dtype=np.float32)
    m[np.arange(h_in), np.arange(h_in) // factor] = 1.0 / float(factor * factor)
    return jnp.asarray(m, dtype=dtype)


# --------------------------------------------------------------------------- #
# kernel
# --------------------------------------------------------------------------- #
def _make_kernel(scale_infos, *, bc, rb, use_epe, loss_type):
    """scale_infos[i] = (pool_factor_i, hs_i, ws_i, mult_i).

    pool_factor is the extra pooling applied at scale i relative to scale i-1
    (k0 for i == 0, then 2); mult_i = weight_i / N_i is folded in at trace time.
    """
    num_scales = len(scale_infos)

    def kernel(*refs):
        tgt_ref = refs[0]
        inp_refs = refs[1:1 + num_scales]
        ph_refs = refs[1 + num_scales:1 + 2 * num_scales]
        out_ref = refs[1 + 2 * num_scales]
        scratch_refs = refs[2 + 2 * num_scales:]

        b = pl.program_id(0)

        @pl.when(b == 0)
        def _():
            out_ref[0, 0] = jnp.float32(0.0)

        total = jnp.float32(0.0)
        src_ref = tgt_ref                       # rows grouped as (bc_row, w)
        for i, (factor, hs, ws, mult) in enumerate(scale_infos):
            rows = rb * ws
            # -- W half of the average pool: sum `factor` strided row sets (VPU)
            ssum = src_ref[pl.ds(0, rows, stride=factor), :]
            for d in range(1, factor):
                ssum = ssum + src_ref[pl.ds(d, rows, stride=factor), :]
            # -- H half of the average pool: one small lane-contraction matmul
            pooled = jnp.dot(ssum, ph_refs[i][...],
                             preferred_element_type=jnp.float32)   # (rb*ws, hs)
            if i + 1 < num_scales:              # feed the pooling pyramid
                scratch_refs[i][...] = pooled
                src_ref = scratch_refs[i]

            diff = pooled - inp_refs[i][...]
            if use_epe:
                # torch.norm(target_ - input_, 2, dim=2): reduce over H (= lanes)
                epe_sq = jnp.sum(diff * diff, axis=-1, keepdims=True)  # (rb*ws,1)
                if loss_type == "MSE":
                    val = epe_sq
                elif loss_type == "L1":
                    val = jnp.sqrt(epe_sq)
                else:                                     # SmoothL1, beta = 1
                    epe = jnp.sqrt(epe_sq)
                    val = jnp.where(epe < 1.0, 0.5 * epe_sq, epe - 0.5)
            else:
                if loss_type == "L1":
                    val = jnp.abs(diff)
                elif loss_type == "MSE":
                    val = diff * diff
                else:
                    ad = jnp.abs(diff)
                    val = jnp.where(ad < 1.0, 0.5 * diff * diff, ad - 0.5)

            if bc % rb == 0:                    # every row block is full
                part = jnp.sum(val)
            else:                               # mask the ragged last row block
                row_idx = jax.lax.broadcasted_iota(jnp.int32, (val.shape[0], 1), 0)
                lim = jnp.minimum(rb, bc - b * rb) * ws
                part = jnp.sum(jnp.where(row_idx < lim, val, 0.0))
            total = total + jnp.float32(mult) * part

        out_ref[0, 0] += total

    return kernel


# --------------------------------------------------------------------------- #
# launcher
# --------------------------------------------------------------------------- #
def _fused_loss(target, inputs, pool_ks, mults, use_epe, loss_type):
    """One pallas_call computing sum_i mults[i] * sum(per-element loss_i)."""
    b, c, h, w = target.shape
    bc = b * c
    num_scales = len(inputs)

    # ---- host-side views: put H on the lane axis -> (B*C*W, H) --------------
    tgt_dtype = jnp.bfloat16 if target.dtype == jnp.bfloat16 else jnp.float32
    tgt2 = jnp.swapaxes(target, 2, 3).reshape(bc * w, h).astype(tgt_dtype)

    infos, inp2, ph_mats = [], [], []
    prev_hs = h
    for i, (inp, k) in enumerate(zip(inputs, pool_ks)):
        # TODO(synk): PyTorch AvgPool2d floors non-divisible spatial sizes;
        # that case is asserted out here instead of being emulated.
        assert h % k == 0 and w % k == 0, (
            f"H and W must be divisible by the pooling size (H={h}, W={w}, k={k})")
        hs, ws = h // k, w // k
        assert inp.shape == (b, c, hs, ws), (inp.shape, (b, c, hs, ws))
        inp2.append(jnp.swapaxes(inp, 2, 3).reshape(bc * ws, hs)
                    .astype(jnp.float32))
        factor = k if i == 0 else 2
        infos.append((factor, hs, ws, float(mults[i])))
        mat_dtype = tgt_dtype if i == 0 else jnp.float32   # pyramid scratch is f32
        ph_mats.append(_pool_h_matrix(prev_hs, factor, mat_dtype))
        prev_hs = hs

    # ---- row blocking: biggest block whose (double-buffered) target tile stays
    #      inside a VMEM budget that is safe on v7x's 64 MiB ------------------
    budget = 8 << 20                                 # bytes per target block
    bytes_per_row = w * h * np.dtype(tgt_dtype).itemsize
    max_rb = max(1, budget // bytes_per_row)
    if bc <= max_rb:
        rb = bc                                      # single block along rows
    else:
        rb = max(8, (max_rb // 8) * 8)               # keep sublane dim 8-aligned
    n_blocks = -(-bc // rb)

    blk_bytes = rb * bytes_per_row
    blk_bytes += sum(rb * ws * hs * 4 for (_, hs, ws, _) in infos)
    blk_bytes += sum(int(m.size) * m.dtype.itemsize for m in ph_mats)
    scratch_bytes = sum(rb * infos[i][2] * infos[i][1] * 4
                        for i in range(num_scales - 1))
    vmem_limit = int(min(64 << 20, 2 * blk_bytes + scratch_bytes + (4 << 20)))

    in_specs = [pl.BlockSpec((rb * w, h), lambda i: (i, 0))]
    for (_, hs, ws, _) in infos:
        in_specs.append(pl.BlockSpec((rb * ws, hs), lambda i: (i, 0)))
    for m in ph_mats:
        in_specs.append(pl.BlockSpec(m.shape, lambda i: (0, 0)))

    kernel = _make_kernel(tuple(infos), bc=bc, rb=rb,
                          use_epe=use_epe, loss_type=loss_type)

    # TODO(synk): for v7x megacore, split the row axis into grid=(2, n/2) with
    # ("parallel", "arbitrary") and two partial sums combined in the wrapper.
    out = pl.pallas_call(
        kernel,
        out_shape=jax.ShapeDtypeStruct((1, 1), jnp.float32),
        grid=(n_blocks,),
        in_specs=in_specs,
        out_specs=pl.BlockSpec((1, 1), lambda i: (0, 0),
                               memory_space=pltpu.MemorySpace.SMEM),
        scratch_shapes=[pltpu.VMEM((rb * infos[i][2], infos[i][1]), jnp.float32)
                        for i in range(num_scales - 1)],
        compiler_params=pltpu.CompilerParams(
            dimension_semantics=("arbitrary",),
            vmem_limit_bytes=vmem_limit),
    )(tgt2, *inp2, *ph_mats)
    return out[0, 0]


# --------------------------------------------------------------------------- #
# module
# --------------------------------------------------------------------------- #
class MultiScaleLoss:
    """JAX/Pallas port of the PyTorch MultiScaleLoss forward pass."""

    def __init__(self, scales, downscale, weights=None, loss="L1"):
        self.downscale = downscale
        self.scales = scales
        if weights is None:
            self._weights = [1.0] * scales
        else:
            self._weights = [float(wt) for wt in weights]
        assert len(self._weights) == scales
        assert loss in ("L1", "MSE", "SmoothL1")
        self.loss_type = loss

    def __call__(self, input, target):
        b, c, h, w = target.shape
        if isinstance(input, tuple):
            pool_ks = [self.downscale * 2 ** i for i in range(len(input))]
            # loss(EPE, 0) is a mean over the (B, C, Ws) EPE elements; fold
            # weight_i / N_i into a single per-scale multiplier.
            mults = [self._weights[i] / float(b * c * (w // k))
                     for i, k in enumerate(pool_ks)]
            return _fused_loss(target, list(input), pool_ks, mults,
                               use_epe=True, loss_type=self.loss_type)
        else:
            k = self.downscale
            mults = [1.0 / float(b * c * (h // k) * (w // k))]
            return _fused_loss(target, [input], [k], mults,
                               use_epe=False, loss_type=self.loss_type)


# --------------------------------------------------------------------------- #
# pure-JAX reference
# --------------------------------------------------------------------------- #
def _ref_avgpool(x, k):
    b, c, h, w = x.shape
    return x.reshape(b, c, h // k, k, w // k, k).mean(axis=(3, 5))


def _ref_multiscale(inputs, target, downscale, weights):
    out = jnp.float32(0.0)
    for i, inp in enumerate(inputs):
        k = downscale * 2 ** i
        t = _ref_avgpool(target, k)
        epe = jnp.sqrt(jnp.sum((t - inp) ** 2, axis=2))   # torch.norm(., 2, 2)
        out = out + weights[i] * jnp.mean(epe)            # L1Loss(EPE, 0)
    return out


def _ref_plain(inp, target, downscale):
    t = _ref_avgpool(target, downscale)
    return jnp.mean(jnp.abs(inp - t))                     # L1Loss


# --------------------------------------------------------------------------- #
# main
# --------------------------------------------------------------------------- #
if __name__ == "__main__":
    key = jax.random.PRNGKey(0)
    k1, k2, k3, k4 = jax.random.split(key, 4)

    B, C, H, W = 2, 2, 16, 16                 # flow-style NCHW target
    downscale, scales = 2, 2
    weights = [1.0, 0.5]

    target = jax.random.normal(k1, (B, C, H, W), jnp.float32)
    inputs = (
        jax.random.normal(k2, (B, C, H // 2, W // 2), jnp.float32),
        jax.random.normal(k3, (B, C, H // 4, W // 4), jnp.float32),
    )

    criterion = MultiScaleLoss(scales, downscale, weights=weights, loss="L1")

    # tuple branch (multi-scale EPE loss), single fused kernel launch
    out = jax.block_until_ready(criterion(inputs, target))
    ref = _ref_multiscale(inputs, target, downscale, weights)
    assert jnp.allclose(out, ref, rtol=1e-4, atol=1e-5), (out, ref)

    # plain (non-tuple) branch: loss(input, AvgPool2d(downscale)(target))
    single = jax.random.normal(k4, (B, C, H // 2, W // 2), jnp.float32)
    out2 = jax.block_until_ready(criterion(single, target))
    ref2 = _ref_plain(single, target, downscale)
    assert jnp.allclose(out2, ref2, rtol=1e-4, atol=1e-5), (out2, ref2)

    print("KERNEL_OK")
</pallas_src>

<mosaic_0001>
module attributes {stable_mosaic.version = 11 : i64} {
  func.func @kernel(%arg0: i32, %arg1: memref<64x16xf32, #tpu.memory_space<vmem>>, %arg2: memref<32x8xf32, #tpu.memory_space<vmem>>, %arg3: memref<16x4xf32, #tpu.memory_space<vmem>>, %arg4: memref<16x8xf32, #tpu.memory_space<vmem>>, %arg5: memref<8x4xf32, #tpu.memory_space<vmem>>, %arg6: memref<1x1xf32, #tpu.memory_space<smem>>, %arg7: memref<32x8xf32, #tpu.memory_space<vmem>>) attributes {dimension_semantics = [#tpu.dimension_semantics<arbitrary>], iteration_bounds = array<i64: 1>, scalar_prefetch = 0 : i64, scratch_operands = 1 : i64, tpu.core_type = #tpu.core_type<tc>, window_params = [{transform_indices = @transform_0, window_bounds = array<i64: 64, 16>}, {transform_indices = @transform_1, window_bounds = array<i64: 32, 8>}, {transform_indices = @transform_2, window_bounds = array<i64: 16, 4>}, {pipeline_mode = #tpu.pipeline_mode<synchronous>, transform_indices = @transform_3, window_bounds = array<i64: 16, 8>}, {pipeline_mode = #tpu.pipeline_mode<synchronous>, transform_indices = @transform_4, window_bounds = array<i64: 8, 4>}, {transform_indices = @transform_5, window_bounds = array<i64: 1, 1>}]} {
    %c0_i32 = arith.constant 0 : i32
    %0 = arith.cmpi eq, %arg0, %c0_i32 : i32
    %1 = arith.extui %0 : i1 to i32
    %c0_i32_0 = arith.constant 0 : i32
    %2 = arith.cmpi ne, %1, %c0_i32_0 : i32
    scf.if %2 {
      %cst_29 = arith.constant 0.000000e+00 : f32
      %c0_30 = arith.constant 0 : index
      %c0_31 = arith.constant 0 : index
      %41 = memref.load %arg6[%c0_30, %c0_31] : memref<1x1xf32, #tpu.memory_space<smem>>
      memref.store %cst_29, %arg6[%c0_30, %c0_31] : memref<1x1xf32, #tpu.memory_space<smem>>
    } else {
    }
    %c0 = arith.constant 0 : index
    %c0_1 = arith.constant 0 : index
    %3 = tpu.strided_load %arg1[%c0, %c0_1] {strides = array<i32: 2, 1>} : memref<64x16xf32, #tpu.memory_space<vmem>>, vector<32x16xf32>
    %c1 = arith.constant 1 : index
    %c0_2 = arith.constant 0 : index
    %4 = tpu.strided_load %arg1[%c1, %c0_2] {strides = array<i32: 2, 1>} : memref<64x16xf32, #tpu.memory_space<vmem>>, vector<32x16xf32>
    %5 = arith.addf %3, %4 : vector<32x16xf32>
    %c0_3 = arith.constant 0 : index
    %c0_4 = arith.constant 0 : index
    %6 = vector.load %arg4[%c0_3, %c0_4] : memref<16x8xf32, #tpu.memory_space<vmem>>, vector<16x8xf32>
    %cst = arith.constant dense<0.000000e+00> : vector<32x8xf32>
    %7 = tpu.matmul %5, %6, %cst {dimension_numbers = #tpu.dot_dimension_numbers<[1], [0], [0], [1], [0, 0, 1, 1], [], []>} : vector<32x16xf32>, vector<16x8xf32>, vector<32x8xf32> -> vector<32x8xf32>
    %c0_5 = arith.constant 0 : index
    %c0_6 = arith.constant 0 : index
    %8 = vector.load %arg7[%c0_5, %c0_6] : memref<32x8xf32, #tpu.memory_space<vmem>>, vector<32x8xf32>
    tpu.vector_store %arg7[%c0_5, %c0_6], %7 {strides = array<i32>} : memref<32x8xf32, #tpu.memory_space<vmem>>, vector<32x8xf32>,
    %c0_7 = arith.constant 0 : index
    %c0_8 = arith.constant 0 : index
    %9 = vector.load %arg2[%c0_7, %c0_8] : memref<32x8xf32, #tpu.memory_space<vmem>>, vector<32x8xf32>
    %10 = arith.subf %7, %9 : vector<32x8xf32>
    %11 = arith.mulf %10, %10 : vector<32x8xf32>
    %cst_9 = arith.constant dense<0.000000e+00> : vector<32xf32>
    %12 = vector.multi_reduction <add>, %11, %cst_9 [1] : vector<32x8xf32> to vector<32xf32>
    %13 = vector.shape_cast %12 : vector<32xf32> to vector<32x1xf32>
    %14 = math.sqrt %13 : vector<32x1xf32>
    %15 = vector.shape_cast %14 : vector<32x1xf32> to vector<1x32x1xf32>
    %cst_10 = arith.constant dense<0.000000e+00> : vector<1xf32>
    %16 = vector.multi_reduction <add>, %15, %cst_10 [1, 2] : vector<1x32x1xf32> to vector<1xf32>
    %17 = vector.shape_cast %16 : vector<1xf32> to vector<1x1x1xf32>
    %18 = vector.extract %17[0, 0, 0] : f32 from vector<1x1x1xf32>
    %cst_11 = arith.constant 3.125000e-02 : f32
    %19 = arith.mulf %cst_11, %18 : f32
    %cst_12 = arith.constant 0.000000e+00 : f32
    %20 = arith.addf %cst_12, %19 : f32
    %c0_13 = arith.constant 0 : index
    %c0_14 = arith.constant 0 : index
    %21 = tpu.strided_load %arg7[%c0_13, %c0_14] {strides = array<i32: 2, 1>} : memref<32x8xf32, #tpu.memory_space<vmem>>, vector<16x8xf32>
    %c1_15 = arith.constant 1 : index
    %c0_16 = arith.constant 0 : index
    %22 = tpu.strided_load %arg7[%c1_15, %c0_16] {strides = array<i32: 2, 1>} : memref<32x8xf32, #tpu.memory_space<vmem>>, vector<16x8xf32>
    %23 = arith.addf %21, %22 : vector<16x8xf32>
    %c0_17 = arith.constant 0 : index
    %c0_18 = arith.constant 0 : index
    %24 = vector.load %arg5[%c0_17, %c0_18] : memref<8x4xf32, #tpu.memory_space<vmem>>, vector<8x4xf32>
    %cst_19 = arith.constant dense<0.000000e+00> : vector<16x4xf32>
    %25 = tpu.matmul %23, %24, %cst_19 {dimension_numbers = #tpu.dot_dimension_numbers<[1], [0], [0], [1], [0, 0, 1, 1], [], []>} : vector<16x8xf32>, vector<8x4xf32>, vector<16x4xf32> -> vector<16x4xf32>
    %c0_20 = arith.constant 0 : index
    %c0_21 = arith.constant 0 : index
    %26 = vector.load %arg3[%c0_20, %c0_21] : memref<16x4xf32, #tpu.memory_space<vmem>>, vector<16x4xf32>
    %27 = arith.subf %25, %26 : vector<16x4xf32>
    %28 = arith.mulf %27, %27 : vector<16x4xf32>
    %cst_22 = arith.constant dense<0.000000e+00> : vector<16xf32>
    %29 = vector.multi_reduction <add>, %28, %cst_22 [1] : vector<16x4xf32> to vector<16xf32>
    %30 = vector.shape_cast %29 : vector<16xf32> to vector<16x1xf32>
    %31 = math.sqrt %30 : vector<16x1xf32>
    %32 = vector.shape_cast %31 : vector<16x1xf32> to vector<1x16x1xf32>
    %cst_23 = arith.constant dense<0.000000e+00> : vector<1xf32>
    %33 = vector.multi_reduction <add>, %32, %cst_23 [1, 2] : vector<1x16x1xf32> to vector<1xf32>
    %34 = vector.shape_cast %33 : vector<1xf32> to vector<1x1x1xf32>
    %35 = vector.extract %34[0, 0, 0] : f32 from vector<1x1x1xf32>
    %cst_24 = arith.constant 3.125000e-02 : f32
    %36 = arith.mulf %cst_24, %35 : f32
    %37 = arith.addf %20, %36 : f32
    %c0_25 = arith.constant 0 : index
    %c0_26 = arith.constant 0 : index
    %38 = memref.load %arg6[%c0_25, %c0_26] : memref<1x1xf32, #tpu.memory_space<smem>>
    %39 = arith.addf %38, %37 : f32
    %c0_27 = arith.constant 0 : index
    %c0_28 = arith.constant 0 : index
    %40 = memref.load %arg6[%c0_27, %c0_28] : memref<1x1xf32, #tpu.memory_space<smem>>
    memref.store %39, %arg6[%c0_27, %c0_28] : memref<1x1xf32, #tpu.memory_space<smem>>
    return
  }
  func.func @transform_0(%arg0: i32) -> (i32, i32) {
    %c0_i32 = arith.constant 0 : i32
    %c0_i32_0 = arith.constant 0 : i32
    return %arg0, %c0_i32 : i32, i32
  }
  func.func @transform_1(%arg0: i32) -> (i32, i32) {
    %c0_i32 = arith.constant 0 : i32
    %c0_i32_0 = arith.constant 0 : i32
    return %arg0, %c0_i32 : i32, i32
  }
  func.func @transform_2(%arg0: i32) -> (i32, i32) {
    %c0_i32 = arith.constant 0 : i32
    %c0_i32_0 = arith.constant 0 : i32
    return %arg0, %c0_i32 : i32, i32
  }
  func.func @transform_3(%arg0: i32) -> (i32, i32) {
    %c0_i32 = arith.constant 0 : i32
    %c0_i32_0 = arith.constant 0 : i32
    %c0_i32_1 = arith.constant 0 : i32
    return %c0_i32, %c0_i32_0 : i32, i32
  }
  func.func @transform_4(%arg0: i32) -> (i32, i32) {
    %c0_i32 = arith.constant 0 : i32
    %c0_i32_0 = arith.constant 0 : i32
    %c0_i32_1 = arith.constant 0 : i32
    return %c0_i32, %c0_i32_0 : i32, i32
  }
  func.func @transform_5(%arg0: i32) -> (i32, i32) {
    %c0_i32 = arith.constant 0 : i32
    %c0_i32_0 = arith.constant 0 : i32
    %c0_i32_1 = arith.constant 0 : i32
    return %c0_i32, %c0_i32_0 : i32, i32
  }
}

</mosaic_0001>

<bundles_post_ra>
// kernel: tpu_custom_call.1
= control target key start
LH: loop header
LB: loop body
LE: loop exit
PB: predicated region body
PF: predicated region fallthrough
CT: control target
= control target key end

     0   :  { %vm48_vm0 = vcmask 130048   ;;  %s556_s0 = inlined_call_operand.vmem [shape: f32[64,16], index: 0, kind: input, shape index: {}]   ;;  %s557_s1 = inlined_call_operand.vmem [shape: f32[32,8], index: 1, kind: input, shape index: {}]   ;;  %s558_s2 = inlined_call_operand.vmem [shape: f32[16,4], index: 2, kind: input, shape index: {}]   ;;  %s559_s3 = inlined_call_operand.vmem [shape: f32[16,8], index: 3, kind: input, shape index: {}]   ;;  %s560_s4 = inlined_call_operand.vmem [shape: f32[8,4], index: 4, kind: input, shape index: {}]   ;;  %s561_s5 = inlined_call_operand.hbm [shape: f32[1,1], index: 5, kind: output, shape index: {}]  }
   0x1   :  { %v46_v0 = vld [vmem:[%s559_s3] sm:$0xff]  ;;  %v47_v1 = vld [vmem:[%s559_s3 + $0x8] sm:$0xff]  ;;  %v371_v5 = vld [vmem:[%s556_s0 + $0x10] ss:$2 sm:$0xff] }
   0x2   :  { %v27_v2 = vld [vmem:[%s556_s0] ss:$2 sm:$0xff]  ;;  %v408_v3 = vpack.c.bf16 %v47_v1, %v46_v0  ;;  %v374_v4 = vld [vmem:[%s556_s0 + $0x1] ss:$2 sm:$0xff]  ;;  %v375_v6 = vld [vmem:[%s556_s0 + $0x11] ss:$2 sm:$0xff] }
   0x3   :  { %v42_v7 = vadd.f32 %v374_v4, %v27_v2  ;;  %v372_v8 = vld [vmem:[%s556_s0 + $0x20] ss:$2 sm:$0xff]  ;;  %v376_v9 = vld [vmem:[%s556_s0 + $0x21] ss:$2 sm:$0xff]  ;;  %v43_v10 = vadd.f32 %v375_v6, %v371_v5 }
   0x4   :  { %409 = vmatprep.subr.bf16.mxu0 %v408_v3 }
   0x5   :  { %10 = vsyncpa [#allocation4], 0  ;;  %411 = vmatpush3.bf16.msra.mxu0 %v408_v3  ;;  %397 = vmatprep.mubr.msk.f32.mxu0 %vm48_vm0, %v42_v7  ;;  %v44_v11 = vadd.f32 %v376_v9, %v372_v8  ;;  %v373_v12 = vld [vmem:[%s556_s0 + $0x30] ss:$2 sm:$0xff]  ;;  %v377_v13 = vld [vmem:[%s556_s0 + $0x31] ss:$2 sm:$0xff] }
   0x6   :  { %v45_v14 = vadd.f32 %v377_v13, %v373_v12  ;;  %v231_v15 = vld [vmem:[%s560_s4] sm:$0xff]  ;;  %vm146_vm1 = vcmask 64512   ;;  %v152_v16 = vld [vmem:[%s557_s1 + $0x8] sm:$0xff]  ;;  %v154_v22 = vld [vmem:[%s557_s1 + $0x18] sm:$0xff]  ;;  %vm203_vm8 = vcmask 7168   ;;  %vm319_vm9 = vcmask 31744  }
   0x7   :  { %403 = vmatprep.subr.mxu1 %v231_v15  ;;  %v151_v17 = vld [vmem:[%s557_s1] sm:$0xff]  ;;  %v153_v23 = vld [vmem:[%s557_s1 + $0x10] sm:$0xff]  ;;  %v314_v60 = vld [vmem:[%s558_s2 + $0x8] sm:$0xff]  ;;  %s430_s29 = scalar_lea.hbm %s561_s5, 16 }
   0x8   :  { %398 = vmatmul.mubr.msk.f32.vlgmr.msra.gmra.mrb[0].mxu0 %vm48_vm0, %v43_v10  ;;  %404 = vmatpush3.msra.mxu1 %v231_v15  ;;  %v313_v62 = vld [vmem:[%s558_s2] sm:$0xff]  ;;  %p431_p0 = scmp.ne.s32.totalorder %s561_s5, %s430_s29  ;;  %p434_p1 = scmp.lt.u32.totalorder %s430_s29, %s561_s5 }
   0x9   :  { %400 = vmatprep.mubr.msk.f32.mxu0 %vm48_vm0, %v44_v11 }
   0xa   :  { %p436_p2 = pnand %p434_p1, %p431_p0 }
   0xc   :  { %401 = vmatmul.mubr.msk.f32.gmra.mrb[2].mxu0 %vm48_vm0, %v45_v14 }
  0xdb   :  { %v399_v18 = vpop.f32.mrb[0].mxu0 }
  0xdc   :  { %148 = vst.msk [vmem:[#allocation2 + $0x8] sm:$0xff] %vm146_vm1, %v399_v18  ;;  %v156_v19 = vsub.f32 %v399_v18, %v152_v16  ;;  %v127_v20 = vpop.f32.mrb[1].mxu0 }
  0xdd   :  { %147 = vst.msk [vmem:[#allocation2] sm:$0xff] %vm146_vm1, %v127_v20  ;;  %v155_v21 = vsub.f32 %v127_v20, %v151_v17 }
  0xde   :  { %v160_v24 = vmul.f32 %v156_v19, %v156_v19 }
  0xdf   :  { %v402_v25 = vpop.f32.mrb[2].mxu0  ;;  %v159_v26 = vmul.f32 %v155_v21, %v155_v21 }
  0xe0   :  { %150 = vst.msk [vmem:[#allocation2 + $0x18] sm:$0xff] %vm146_vm1, %v402_v25  ;;  %v158_v27 = vsub.f32 %v402_v25, %v154_v22  ;;  %v137_v28 = vpop.f32.mrb[3].mxu0  ;;  %v166_v29 = vsel %vm146_vm1, %v160_v24, 0.0 }
  0xe1   :  { %149 = vst.msk [vmem:[#allocation2 + $0x10] sm:$0xff] %vm146_vm1, %v137_v28  ;;  %v157_v30 = vsub.f32 %v137_v28, %v153_v23  ;;  %167 = vadd.xlane.f32.xlu0 %v166_v29  ;;  %v163_v33 = vsel %vm146_vm1, %v159_v26, 0.0 }
  0xe2   :  { %v162_v31 = vmul.f32 %v158_v27, %v158_v27 }
  0xe3   :  { %v161_v32 = vmul.f32 %v157_v30, %v157_v30 }
  0xe4   :  { %v172_v34 = vsel %vm146_vm1, %v162_v31, 0.0  ;;  %v222_v35 = vld [vmem:[#allocation2] ss:$2 sm:$0xff]  ;;  %v226_v36 = vld [vmem:[#allocation2 + $0x1] ss:$2 sm:$0xff] }
  0xe5   :  { %164 = vadd.xlane.f32.xlu0 %v163_v33  ;;  %173 = vadd.xlane.f32.xlu1 %v172_v34  ;;  %v229_v37 = vadd.f32 %v226_v36, %v222_v35  ;;  %v169_v38 = vsel %vm146_vm1, %v161_v32, 0.0 }
  0xe7   :  { %405 = vmatprep.mubr.msk.f32.mxu1 %vm146_vm1, %v229_v37 }
  0xe8   :  { %v224_v39 = vld [vmem:[#allocation2 + $0x10] ss:$2 sm:$0xff]  ;;  %v228_v40 = vld [vmem:[#allocation2 + $0x11] ss:$2 sm:$0xff] }
  0xe9   :  { %170 = vadd.xlane.f32.xlu1 %v169_v38  ;;  %v230_v41 = vadd.f32 %v228_v40, %v224_v39 }
  0xeb   :  { %406 = vmatmul.mubr.msk.f32.vlgmr.msra.gmra.mrb[0].mxu1 %vm146_vm1, %v230_v41 }
 0x16e   :  { %v168_v42 = vpop.xlane.xlu0 %167 }
 0x16f   :  { %vm184_vm3 = vcmp.eq.f32.partialorder %v168_v42, inf  ;;  %v187_v57 = vand.u32 2147483648, %v168_v42  ;;  %vm186_vm6 = vcmp.eq.f32.partialorder %v168_v42, 0.0 }
 0x172   :  { %v174_v43 = vpop.xlane.xlu1 %173  ;;  %v165_v44 = vpop.xlane.xlu0 %164 }
 0x173   :  { %418 = vrsqrt.f32 %v165_v44  ;;  %vm177_vm2 = vcmp.eq.f32.partialorder %v165_v44, inf  ;;  %v180_v54 = vand.u32 2147483648, %v165_v44  ;;  %vm179_vm5 = vcmp.eq.f32.partialorder %v165_v44, 0.0 }
 0x174   :  { %420 = vrsqrt.f32 %v168_v42  ;;  %vm198_vm10 = vcmp.eq.f32.partialorder %v174_v43, inf  ;;  %v201_v10 = vand.u32 2147483648, %v174_v43  ;;  %vm200_vm11 = vcmp.eq.f32.partialorder %v174_v43, 0.0 }
 0x176   :  { %v171_v45 = vpop.xlane.xlu1 %170 }
 0x177   :  { %422 = vrsqrt.f32 %v171_v45  ;;  %vm191_vm4 = vcmp.eq.f32.partialorder %v171_v45, inf  ;;  %v194_v59 = vand.u32 2147483648, %v171_v45  ;;  %vm193_vm7 = vcmp.eq.f32.partialorder %v171_v45, 0.0 }
 0x178   :  { %424 = vrsqrt.f32 %v174_v43 }
 0x17d   :  { %v419_v46 = vpop.eup %418 }
 0x17e   :  { %v421_v47 = vpop.eup %420  ;;  %v176_v49 = vmul.f32 %v419_v46, %v165_v44 }
 0x17f   :  { %v183_v50 = vmul.f32 %v421_v47, %v168_v42 }
 0x180   :  { %v178_v52 = vsel %vm177_vm2, %v165_v44, %v176_v49 }
 0x181   :  { %v423_v48 = vpop.eup %422  ;;  %v185_v55 = vsel %vm184_vm3, %v168_v42, %v183_v50  ;;  %v181_v58 = vsel %vm179_vm5, %v180_v54, %v178_v52 }
 0x182   :  { %v190_v51 = vmul.f32 %v423_v48, %v171_v45  ;;  %v425_v53 = vpop.eup %424  ;;  %v188_v63 = vsel %vm186_vm6, %v187_v57, %v185_v55  ;;  %v204_v2 = vsel %vm203_vm8, %v181_v58, 0.0 }
 0x183   :  { %v197_v61 = vmul.f32 %v425_v53, %v174_v43  ;;  %v205_v7 = vsel %vm203_vm8, %v188_v63, 0.0 }
 0x184   :  { %v192_v56 = vsel %vm191_vm4, %v171_v45, %v190_v51  ;;  %v206_v11 = vadd.f32 %v205_v7, %v204_v2 }
 0x185   :  { %v195_v0 = vsel %vm193_vm7, %v194_v59, %v192_v56  ;;  %v199_v6 = vsel %vm198_vm10, %v174_v43, %v197_v61 }
 0x186   :  { %v207_v8 = vsel %vm203_vm8, %v195_v0, 0.0  ;;  %v202_v14 = vsel %vm200_vm11, %v201_v10, %v199_v6 }
 0x187   :  { %v208_v15 = vadd.f32 %v207_v8, %v206_v11  ;;  %v209_v17 = vsel %vm203_vm8, %v202_v14, 0.0 }
 0x189   :  { %v210_v18 = vadd.f32 %v209_v17, %v208_v15 }
 0x1be   :  { %v407_v1 = vpop.f32.mrb[0].mxu1 }
 0x1bf   :  { %v316_v3 = vsub.f32 %v407_v1, %v314_v60  ;;  %v304_v4 = vpop.f32.mrb[1].mxu1 }
 0x1c0   :  { %v315_v5 = vsub.f32 %v304_v4, %v313_v62 }
 0x1c1   :  { %v318_v9 = vmul.f32 %v316_v3, %v316_v3 }
 0x1c2   :  { %v317_v12 = vmul.f32 %v315_v5, %v315_v5 }
 0x1c3   :  { %v323_v13 = vsel %vm319_vm9, %v318_v9, 0.0 }
 0x1c4   :  { %324 = vadd.xlane.f32.xlu1 %v323_v13  ;;  %v320_v16 = vsel %vm319_vm9, %v317_v12, 0.0 }
 0x1c5   :  { %321 = vadd.xlane.f32.xlu0 %v320_v16 }
 0x1c9   :  { %211 = vadd.xlane.f32.xlu0 %v210_v18 }
 0x251   :  { %v325_v19 = vpop.xlane.xlu1 %324 }
 0x252   :  { %426 = vrsqrt.f32 %v325_v19  ;;  %v322_v20 = vpop.xlane.xlu0 %321  ;;  %vm335_vm12 = vcmp.eq.f32.partialorder %v325_v19, inf  ;;  %vm337_vm13 = vcmp.eq.f32.partialorder %v325_v19, 0.0  ;;  %v338_v30 = vand.u32 2147483648, %v325_v19 }
 0x253   :  { %428 = vrsqrt.f32 %v322_v20  ;;  %vm328_vm14 = vcmp.eq.f32.partialorder %v322_v20, inf  ;;  %v331_v32 = vand.u32 2147483648, %v322_v20  ;;  %vm330_vm15 = vcmp.eq.f32.partialorder %v322_v20, 0.0 }
 0x256   :  { %v212_v21 = vpop.xlane.xlu0 %211 }
 0x257   :  { %v213_v22 = vrot.slane %v212_v21, 4 }
 0x259   :  { %v214_v23 = vadd.f32 %v213_v22, %v212_v21 }
 0x25b   :  { %v215_v24 = vrot.slane %v214_v23, 2 }
 0x25c   :  { %v427_v25 = vpop.eup %426 }
 0x25d   :  { %v429_v26 = vpop.eup %428  ;;  %v216_v27 = vadd.f32 %v215_v24, %v214_v23  ;;  %v334_v28 = vmul.f32 %v427_v25, %v325_v19 }
 0x25e   :  { %v327_v29 = vmul.f32 %v429_v26, %v322_v20 }
 0x25f   :  { %v217_v31 = vrot.slane %v216_v27, 1  ;;  %v336_v33 = vsel %vm335_vm12, %v325_v19, %v334_v28 }
 0x260   :  { %v329_v34 = vsel %vm328_vm14, %v322_v20, %v327_v29  ;;  %v339_v35 = vsel %vm337_vm13, %v338_v30, %v336_v33 }
 0x261   :  { %v218_v36 = vadd.f32 %v217_v31, %v216_v27  ;;  %v332_v37 = vsel %vm330_vm15, %v331_v32, %v329_v34  ;;  %v341_v38 = vsel %vm203_vm8, %v339_v35, 0.0 }
 0x262   :  { %v340_v39 = vsel %vm203_vm8, %v332_v37, 0.0 }
 0x263   :  { %412 = vpush %v218_v36  ;;  %v342_v40 = vadd.f32 %v341_v38, %v340_v39 }
 0x265   :  { %343 = vadd.xlane.f32.xlu1 %v342_v40 }
 0x294   :  { %s413_s2 = spop %412 }
 0x295   :  { %s220_s23 = smul.f32 0.03125, %s413_s2 }
 0x2f2   :  { %v344_v41 = vpop.xlane.xlu1 %343 }
 0x2f3   :  { %v345_v42 = vrot.slane %v344_v41, 4 }
 0x2f5   :  { %v346_v43 = vadd.f32 %v345_v42, %v344_v41 }
 0x2f7   :  { %v347_v44 = vrot.slane %v346_v43, 2 }
 0x2f9   :  { %v348_v45 = vadd.f32 %v347_v44, %v346_v43 }
 0x2fb   :  { %v349_v46 = vrot.slane %v348_v45, 1 }
 0x2fd   :  { %v350_v47 = vadd.f32 %v349_v46, %v348_v45 }
 0x2ff   :  { %414 = vpush %v350_v47 }
 0x330   :  { %s415_s24 = spop %414 }
 0x331   :  { %s352_s25 = smul.f32 0.03125, %s415_s24 }
 0x333   :  { %s353_s26 = sadd.f32 %s352_s25, %s220_s23 }
 0x335   :  { %357 = sst [smem:[#allocation3]] %s353_s26 }
 0x336   :  { %439 = shalt.err (!%p436_p2)
}
 0x337   :  { %s442_s8 = smov [#allocation3]  }
 0x338   :  { %365 = dma.smem_to_hbm %s442_s8, 16, %s561_s5, [#allocation4]  }
 0x339   :  { %440 = dma.done.wait [#allocation4], 16  }
 0x33a   :  { %441 = vsyncadd [#allocation4], 4294967280 }
 0x33b   :  { %369 = sfence }
 0x33c   :  { %370 = vsyncpa [#allocation4], 1 }

</bundles_post_ra>
